<compile_context>
chip_gen: v5e
topology: v5e:2x2
jax: 0.10.0
libtpu: 0.0.40
codegen_flags: <defaults>
</compile_context>

<pallas_src>
import functools

import jax
import jax.numpy as jnp
from jax.experimental import pallas as pl
from jax.experimental.pallas import tpu as pltpu


def _round_up(x, m):
    return ((x + m - 1) // m) * m


def _vmem_budget_bytes():
    """Usable-VMEM budget: ~75% of physical capacity per TensorCore
    (~48 MiB on v7x's 64 MiB, ~96 MiB on v5e/v6e's 128 MiB)."""
    try:
        cap = int(pltpu.get_tpu_info().vmem_capacity_bytes)
    except Exception:  # interpret mode / older runtimes
        cap = 64 * 1024 * 1024
    return (3 * cap) // 4


# ---------------------------------------------------------------------------
# Kernels
# ---------------------------------------------------------------------------
def _fused_kernel(x_ref, w1_ref, b1_ref, w2_ref, b2_ref, o_ref, *, precision):
    # x_ref : (TB, D)   CLS-token feature tile
    # w1_ref: (D, D)    fc1 weight (in, out), VMEM resident
    # b1_ref: (1, D)    fc1 bias (f32)
    # w2_ref: (D, Cp)   fc2 weight (in, out), lane-padded, resident
    # b2_ref: (1, Cp)   fc2 bias (f32, lane-padded)
    # o_ref : (TB, Cp)  logits tile (lane-dense)
    h = jnp.tanh(jnp.dot(x_ref[...], w1_ref[...],
                         preferred_element_type=jnp.float32,
                         precision=precision) + b1_ref[...])
    logits = jnp.dot(h.astype(w2_ref.dtype), w2_ref[...],
                     preferred_element_type=jnp.float32,
                     precision=precision) + b2_ref[...]
    o_ref[...] = logits.astype(o_ref.dtype)


def _kstream_kernel(x_ref, w1_ref, b1_ref, w2_ref, b2_ref, o_ref, acc_ref, *,
                    precision):
    # Fallback for very large D: fc1 reduction streamed over (TK, D) w1 slabs
    # with an f32 VMEM accumulator; epilogue fused into the last K step.
    k = pl.program_id(1)

    @pl.when(k == 0)
    def _init():
        acc_ref[...] = jnp.zeros_like(acc_ref)

    acc_ref[...] += jnp.dot(x_ref[...], w1_ref[...],
                            preferred_element_type=jnp.float32,
                            precision=precision)

    @pl.when(k == pl.num_programs(1) - 1)
    def _finalize():
        h = jnp.tanh(acc_ref[...] + b1_ref[...])
        logits = jnp.dot(h.astype(w2_ref.dtype), w2_ref[...],
                         preferred_element_type=jnp.float32,
                         precision=precision) + b2_ref[...]
        o_ref[...] = logits.astype(o_ref.dtype)


# ---------------------------------------------------------------------------
# Wrapper
# ---------------------------------------------------------------------------
def classifier_forward(x, w1, b1, w2, b2, *,
                       param_dtype=jnp.bfloat16,
                       block_b=256,
                       block_k=None):
    """x: (B, S, D); w1: (D, D) torch-layout (out, in); b1: (D,);
    w2: (C, D) torch-layout; b2: (C,).  Returns (B, C) logits in x.dtype."""
    B, S, D = x.shape
    C = w2.shape[0]

    # ---- glue (one fused XLA pass: strided CLS gather + cast) -------------
    # TODO(synk): folding the CLS slice into the kernel needs a size-1
    # second-minor block (or a manual strided DMA); kept in the wrapper so the
    # BlockSpecs stay within the (8, 128) tiling rules on all generations.
    x_cls = x[:, 0, :].astype(param_dtype)                     # (B, D)
    w1_t = w1.T.astype(param_dtype)                            # (D, D) (in,out)
    w2_t = w2.T.astype(param_dtype)                            # (D, C) (in,out)
    b1_r = b1.astype(jnp.float32).reshape(1, D)                # (1, D)

    c_pad = _round_up(C, 128)                                  # lane-dense out
    w2_p = jnp.pad(w2_t, ((0, 0), (0, c_pad - C)))             # (D, Cp)
    b2_p = jnp.pad(b2.astype(jnp.float32).reshape(1, C),
                   ((0, 0), (0, c_pad - C)))                   # (1, Cp)

    psz = jnp.dtype(param_dtype).itemsize
    osz = jnp.dtype(x.dtype).itemsize
    min_sub = 16 if psz == 2 else 8            # bf16 needs a (16, 128) min tile

    # ---- batch tile: as large as allowed (w1 streamed once per tile) ------
    if B <= block_b:
        tb = B                                 # full dim -> no alignment rule
    else:
        tb = max(min_sub, (block_b // min_sub) * min_sub)

    budget = _vmem_budget_bytes()

    resident = (2 * D * c_pad * psz            # w2 (+ pipeline buffer)
                + 2 * tb * c_pad * osz         # output tiles
                + 2 * (D + c_pad) * 4)         # biases

    def fused_cost(tb_):
        return 2 * tb_ * D * psz + 2 * D * D * psz + resident

    def kstream_cost(tb_, tk_):
        return (2 * tb_ * tk_ * psz + 2 * tk_ * D * psz
                + tb_ * D * 4 + resident)

    k_divisors = [t for t in (1024, 512, 256, 128) if D % t == 0]

    if block_k is not None:
        tk = block_k
        assert D % tk == 0 and (tk % 128 == 0 or tk == D), "bad block_k"
        use_fused = (tk == D)
        est = fused_cost(tb) if use_fused else kstream_cost(tb, tk)
    elif fused_cost(tb) <= budget or not k_divisors:
        # Typical path: whole (D, D) w1 resident, no reduction axis, no
        # accumulator read-modify-write (removes per-K-step grid overhead and
        # the VMEM store-slot tax that hurts v5e most).
        use_fused, tk = True, D
        est = fused_cost(tb)
    else:
        use_fused = False
        tk = next((t for t in k_divisors if kstream_cost(tb, t) <= budget),
                  k_divisors[-1])
        est = kstream_cost(tb, tk)

    vmem_limit = int(min(max(est * 5 // 4, 32 * 1024 * 1024), budget))

    precision = (jax.lax.Precision.HIGHEST
                 if jnp.dtype(param_dtype) == jnp.float32 else None)

    if use_fused:
        grid = (pl.cdiv(B, tb),)
        kernel = functools.partial(_fused_kernel, precision=precision)
        in_specs = [
            pl.BlockSpec((tb, D), lambda i: (i, 0)),        # x (CLS features)
            pl.BlockSpec((D, D), lambda i: (0, 0)),         # w1 (resident)
            pl.BlockSpec((1, D), lambda i: (0, 0)),         # b1
            pl.BlockSpec((D, c_pad), lambda i: (0, 0)),     # w2 (resident)
            pl.BlockSpec((1, c_pad), lambda i: (0, 0)),     # b2
        ]
        out_specs = pl.BlockSpec((tb, c_pad), lambda i: (i, 0))
        scratch_shapes = []
        dim_sem = ("parallel",)
    else:
        grid = (pl.cdiv(B, tb), D // tk)
        kernel = functools.partial(_kstream_kernel, precision=precision)
        in_specs = [
            pl.BlockSpec((tb, tk), lambda i, k: (i, k)),    # x (CLS features)
            pl.BlockSpec((tk, D), lambda i, k: (k, 0)),     # w1 (streamed K)
            pl.BlockSpec((1, D), lambda i, k: (0, 0)),      # b1
            pl.BlockSpec((D, c_pad), lambda i, k: (0, 0)),  # w2 (resident)
            pl.BlockSpec((1, c_pad), lambda i, k: (0, 0)),  # b2
        ]
        out_specs = pl.BlockSpec((tb, c_pad), lambda i, k: (i, 0))
        scratch_shapes = [pltpu.VMEM((tb, D), jnp.float32)]
        dim_sem = ("parallel", "arbitrary")

    out_padded = pl.pallas_call(
        kernel,
        out_shape=jax.ShapeDtypeStruct((B, c_pad), x.dtype),
        grid=grid,
        in_specs=in_specs,
        out_specs=out_specs,
        scratch_shapes=scratch_shapes,
        compiler_params=pltpu.CompilerParams(
            dimension_semantics=dim_sem,
            vmem_limit_bytes=vmem_limit),
    )(x_cls, w1_t, b1_r, w2_p, b2_p)

    return out_padded[:, :C]


if __name__ == "__main__":
    key = jax.random.PRNGKey(0)

    def make_params(key, D, C):
        kw1, kb1, kw2, kb2 = jax.random.split(key, 4)
        lim = 1.0 / jnp.sqrt(jnp.float32(D))
        w1 = jax.random.uniform(kw1, (D, D), jnp.float32, -lim, lim)  # (out,in)
        b1 = jax.random.uniform(kb1, (D,), jnp.float32, -lim, lim)
        w2 = jax.random.uniform(kw2, (C, D), jnp.float32, -lim, lim)  # (out,in)
        b2 = jax.random.uniform(kb2, (C,), jnp.float32, -lim, lim)
        return w1, b1, w2, b2

    def ref_forward(x, w1, b1, w2, b2):
        return jnp.tanh(x[:, 0, :] @ w1.T + b1) @ w2.T + b2

    # Case 1: tiny module-default shapes, f32 params, fused (no-K) path.
    B, S, D, C = 2, 8, 32, 10
    k0, k1, key = jax.random.split(key, 3)
    x = jax.random.normal(k0, (B, S, D), jnp.float32)
    w1, b1, w2, b2 = make_params(k1, D, C)
    out = jax.block_until_ready(
        classifier_forward(x, w1, b1, w2, b2, param_dtype=jnp.float32))
    ref = ref_forward(x, w1, b1, w2, b2)
    assert out.shape == (B, C)
    assert jnp.allclose(out, ref, atol=1e-4, rtol=1e-4)

    # Case 2: same shapes, bf16 params (production default), f32 accumulation.
    out_bf16 = jax.block_until_ready(classifier_forward(x, w1, b1, w2, b2))
    assert out_bf16.shape == (B, C)
    assert jnp.allclose(out_bf16, ref, atol=5e-2, rtol=5e-2)

    # Case 3: force the K-streamed fallback path (grid (3, 2)), f32 params.
    B, S, D, C = 24, 4, 256, 10
    k0, k1, key = jax.random.split(key, 3)
    x = jax.random.normal(k0, (B, S, D), jnp.float32)
    w1, b1, w2, b2 = make_params(k1, D, C)
    out = jax.block_until_ready(
        classifier_forward(x, w1, b1, w2, b2, param_dtype=jnp.float32,
                           block_b=8, block_k=128))
    ref = ref_forward(x, w1, b1, w2, b2)
    assert out.shape == (B, C)
    assert jnp.allclose(out, ref, atol=2e-2, rtol=2e-2)

    # Case 4: fused path with batch tiling + a partial final tile, bf16.
    B, S, D, C = 40, 4, 128, 5
    k0, k1, key = jax.random.split(key, 3)
    x = jax.random.normal(k0, (B, S, D), jnp.float32)
    w1, b1, w2, b2 = make_params(k1, D, C)
    out = jax.block_until_ready(
        classifier_forward(x, w1, b1, w2, b2, block_b=16))
    ref = ref_forward(x, w1, b1, w2, b2)
    assert out.shape == (B, C)
    assert jnp.allclose(out, ref, atol=5e-2, rtol=5e-2)

    print("KERNEL_OK")
</pallas_src>

<mosaic_0001>
module attributes {stable_mosaic.version = 11 : i64} {
  func.func @_fused_kernel(%arg0: i32, %arg1: memref<2x32xf32, #tpu.memory_space<vmem>>, %arg2: memref<32x32xf32, #tpu.memory_space<vmem>>, %arg3: memref<1x32xf32, #tpu.memory_space<vmem>>, %arg4: memref<32x128xf32, #tpu.memory_space<vmem>>, %arg5: memref<1x128xf32, #tpu.memory_space<vmem>>, %arg6: memref<2x128xf32, #tpu.memory_space<vmem>>) attributes {dimension_semantics = [#tpu.dimension_semantics<parallel>], iteration_bounds = array<i64: 1>, scalar_prefetch = 0 : i64, scratch_operands = 0 : i64, tpu.core_type = #tpu.core_type<tc>, window_params = [{transform_indices = @transform_0, window_bounds = array<i64: 2, 32>}, {pipeline_mode = #tpu.pipeline_mode<synchronous>, transform_indices = @transform_1, window_bounds = array<i64: 32, 32>}, {pipeline_mode = #tpu.pipeline_mode<synchronous>, transform_indices = @transform_2, window_bounds = array<i64: 1, 32>}, {pipeline_mode = #tpu.pipeline_mode<synchronous>, transform_indices = @transform_3, window_bounds = array<i64: 32, 128>}, {pipeline_mode = #tpu.pipeline_mode<synchronous>, transform_indices = @transform_4, window_bounds = array<i64: 1, 128>}, {transform_indices = @transform_5, window_bounds = array<i64: 2, 128>}]} {
    %c0 = arith.constant 0 : index
    %c0_0 = arith.constant 0 : index
    %0 = vector.load %arg1[%c0, %c0_0] : memref<2x32xf32, #tpu.memory_space<vmem>>, vector<2x32xf32>
    %c0_1 = arith.constant 0 : index
    %c0_2 = arith.constant 0 : index
    %1 = vector.load %arg2[%c0_1, %c0_2] : memref<32x32xf32, #tpu.memory_space<vmem>>, vector<32x32xf32>
    %cst = arith.constant dense<0.000000e+00> : vector<2x32xf32>
    %2 = tpu.matmul %0, %1, %cst {dimension_numbers = #tpu.dot_dimension_numbers<[1], [0], [0], [1], [0, 0, 1, 1], [], []>, precision = #tpu.contract_precision<fp32>} : vector<2x32xf32>, vector<32x32xf32>, vector<2x32xf32> -> vector<2x32xf32>
    %c0_3 = arith.constant 0 : index
    %c0_4 = arith.constant 0 : index
    %3 = vector.load %arg3[%c0_3, %c0_4] : memref<1x32xf32, #tpu.memory_space<vmem>>, vector<1x32xf32>
    %4 = vector.broadcast %3 : vector<1x32xf32> to vector<2x32xf32>
    %5 = arith.addf %2, %4 : vector<2x32xf32>
    %6 = math.tanh %5 : vector<2x32xf32>
    %c0_5 = arith.constant 0 : index
    %c0_6 = arith.constant 0 : index
    %7 = vector.load %arg4[%c0_5, %c0_6] : memref<32x128xf32, #tpu.memory_space<vmem>>, vector<32x128xf32>
    %cst_7 = arith.constant dense<0.000000e+00> : vector<2x128xf32>
    %8 = tpu.matmul %6, %7, %cst_7 {dimension_numbers = #tpu.dot_dimension_numbers<[1], [0], [0], [1], [0, 0, 1, 1], [], []>, precision = #tpu.contract_precision<fp32>} : vector<2x32xf32>, vector<32x128xf32>, vector<2x128xf32> -> vector<2x128xf32>
    %c0_8 = arith.constant 0 : index
    %c0_9 = arith.constant 0 : index
    %9 = vector.load %arg5[%c0_8, %c0_9] : memref<1x128xf32, #tpu.memory_space<vmem>>, vector<1x128xf32>
    %10 = vector.broadcast %9 : vector<1x128xf32> to vector<2x128xf32>
    %11 = arith.addf %8, %10 : vector<2x128xf32>
    %c0_10 = arith.constant 0 : index
    %c0_11 = arith.constant 0 : index
    %12 = vector.load %arg6[%c0_10, %c0_11] : memref<2x128xf32, #tpu.memory_space<vmem>>, vector<2x128xf32>
    tpu.vector_store %arg6[%c0_10, %c0_11], %11 {strides = array<i32>} : memref<2x128xf32, #tpu.memory_space<vmem>>, vector<2x128xf32>,
    return
  }
  func.func @transform_0(%arg0: i32) -> (i32, i32) {
    %c0_i32 = arith.constant 0 : i32
    %c0_i32_0 = arith.constant 0 : i32
    return %arg0, %c0_i32 : i32, i32
  }
  func.func @transform_1(%arg0: i32) -> (i32, i32) {
    %c0_i32 = arith.constant 0 : i32
    %c0_i32_0 = arith.constant 0 : i32
    %c0_i32_1 = arith.constant 0 : i32
    return %c0_i32, %c0_i32_0 : i32, i32
  }
  func.func @transform_2(%arg0: i32) -> (i32, i32) {
    %c0_i32 = arith.constant 0 : i32
    %c0_i32_0 = arith.constant 0 : i32
    %c0_i32_1 = arith.constant 0 : i32
    return %c0_i32, %c0_i32_0 : i32, i32
  }
  func.func @transform_3(%arg0: i32) -> (i32, i32) {
    %c0_i32 = arith.constant 0 : i32
    %c0_i32_0 = arith.constant 0 : i32
    %c0_i32_1 = arith.constant 0 : i32
    return %c0_i32, %c0_i32_0 : i32, i32
  }
  func.func @transform_4(%arg0: i32) -> (i32, i32) {
    %c0_i32 = arith.constant 0 : i32
    %c0_i32_0 = arith.constant 0 : i32
    %c0_i32_1 = arith.constant 0 : i32
    return %c0_i32, %c0_i32_0 : i32, i32
  }
  func.func @transform_5(%arg0: i32) -> (i32, i32) {
    %c0_i32 = arith.constant 0 : i32
    %c0_i32_0 = arith.constant 0 : i32
    return %arg0, %c0_i32 : i32, i32
  }
}

</mosaic_0001>

<bundles_post_ra>
// kernel: tpu_custom_call.1
= control target key start
LH: loop header
LB: loop body
LE: loop exit
PB: predicated region body
PF: predicated region fallthrough
CT: control target
= control target key end

     0   :  { %10 = vsyncpa [#allocation3], 0  ;;  %s648_s0 = inlined_call_operand.hbm [shape: f32[2,32], index: 0, kind: input, shape index: {}]   ;;  %s649_s1 = inlined_call_operand.hbm [shape: f32[32,32], index: 1, kind: input, shape index: {}]   ;;  %s650_s2 = inlined_call_operand.vmem [shape: f32[1,32], index: 2, kind: input, shape index: {}]   ;;  %s651_s3 = inlined_call_operand.hbm [shape: f32[32,128], index: 3, kind: input, shape index: {}]   ;;  %s652_s4 = inlined_call_operand.vmem [shape: f32[1,128], index: 4, kind: input, shape index: {}]   ;;  %s653_s5 = inlined_call_operand.hbm [shape: f32[2,128], index: 5, kind: output, shape index: {}]  }
   0x1   :  { %11 = vsyncpa [#allocation6], 0  ;;  %s28_s20 = sshll.u32 %s649_s1, 4  ;;  %s29_s20 = int_to_ptr.hbm [resolvable:$true] %s28_s20 }
   0x2   :  { %12 = vsyncpa [#allocation4], 0  ;;  %s592_s21 = smov [#allocation5]   ;;  %s18_s25 = sshll.u32 %s648_s0, 4  ;;  %s19_s25 = int_to_ptr.hbm [resolvable:$true] %s18_s25 }
   0x3   :  { %s30_s22 = sshll.u32 %s592_s21, 4  ;;  %s593_s26 = smov 128   ;;  %s31_s22 = int_to_ptr.vmem [resolvable:$true] %s30_s22 }
   0x4   :  { %s594_s27 = smov 8   ;;  %s595_s28 = smov [#allocation2]  }
   0x5   :  { %36 = dma.hbm_to_vmem [thread:$0]  %s29_s20, 512, %s31_s22, [#allocation6], %s593_s26, %s593_s26, %s594_s27  }
   0x6   :  { %s20_s29 = sshll.u32 %s595_s28, 4  ;;  %s43_s7 = sshll.u32 %s651_s3, 4  ;;  %s21_s29 = int_to_ptr.vmem [resolvable:$true] %s20_s29  ;;  %s44_s7 = int_to_ptr.hbm [resolvable:$true] %s43_s7 }
   0x7   :  { %23 = dma.hbm_to_vmem [thread:$0]  %s19_s25, 32, %s21_s29, [#allocation3]  }
   0x8   :  { %s596_s1 = smov [#allocation7]  }
   0x9   :  { %s45_s8 = sshll.u32 %s596_s1, 4  ;;  %s46_s8 = int_to_ptr.vmem [resolvable:$true] %s45_s8 }
   0xa   :  { %51 = dma.hbm_to_vmem [thread:$0]  %s44_s7, 512, %s46_s8, [#allocation6], %s593_s26, %s593_s26, %s594_s27  }
   0xb   :  { %586 = dma.done.wait [#allocation3], 32  }
   0xc   :  { %587 = vsyncadd [#allocation3], 4294967264 }
   0xd   :  { %588 = dma.done.wait [#allocation6], 1024  }
   0xe   :  { %589 = vsyncadd [#allocation6], 4294966272  ;;  %vm75_vm0 = vcmask 261120   ;;  %v70_v0 = vld [vmem:[#allocation5 + $0x18] sm:$0xff]  ;;  %v69_v1 = vld [vmem:[#allocation5 + $0x10] sm:$0xff]  ;;  %s597_s10 = smov [#allocation8]  }
   0xf   :  { %v68_v2 = vld [vmem:[#allocation5 + $0x8] sm:$0xff]  ;;  %v91_v3 = vand.u32 4294901760, %v70_v0  ;;  %v93_v4 = vand.u32 4294901760, %v69_v1  ;;  %v67_v6 = vld [vmem:[#allocation5] sm:$0xff]  ;;  %v66_v7 = vld [vmem:[#allocation2] sm:$0x3] }
  0x10   :  { %v95_v5 = vand.u32 4294901760, %v68_v2  ;;  %v97_v8 = vand.u32 4294901760, %v67_v6  ;;  %v77_v9 = vsel %vm75_vm0, %v66_v7, 0  ;;  %v268_v31 = vld [vmem:[#allocation7 + $0x18] sm:$0xff]  ;;  %v267_v33 = vld [vmem:[#allocation7 + $0x10] sm:$0xff]  ;;  %v266_v36 = vld [vmem:[#allocation7 + $0x8] sm:$0xff] }
  0x11   :  { %v121_v10 = vsub.f32 %v70_v0, %v91_v3  ;;  %92 = vmatpush.msra.mxu0 %v91_v3  ;;  %v127_v11 = vsub.f32 %v69_v1, %v93_v4  ;;  %192 = vmatpush.msra.mxu3 %v91_v3  ;;  %v99_v13 = vand.u32 4294901760, %v77_v9  ;;  %v288_v32 = vand.u32 4294901760, %v268_v31  ;;  %v265_v40 = vld [vmem:[#allocation7] sm:$0xff]  ;;  %v486_v55 = vld [vmem:[%s650_s2] ss:$0 sm:$0xff]  ;;  %s467_s11 = sshll.u32 %s597_s10, 4  ;;  %s468_s11 = int_to_ptr.vmem [resolvable:$true] %s467_s11 }
  0x12   :  { %v133_v12 = vsub.f32 %v68_v2, %v95_v5  ;;  %v139_v14 = vsub.f32 %v67_v6, %v97_v8  ;;  %v290_v35 = vand.u32 4294901760, %v267_v33  ;;  %v292_v39 = vand.u32 4294901760, %v266_v36  ;;  %s469_s14 = sshll.u32 %s653_s5, 4  ;;  %s470_s14 = int_to_ptr.hbm [resolvable:$true] %s469_s14 }
  0x13   :  { %163 = vmatpush.msra.mxu2 %v121_v10  ;;  %94 = vmatpush.msra.mxu0 %v93_v4  ;;  %v122_v15 = vand.u32 4294901760, %v121_v10  ;;  %v128_v16 = vand.u32 4294901760, %v127_v11  ;;  %v100_v17 = vsub.f32 %v77_v9, %v99_v13  ;;  %v318_v34 = vsub.f32 %v268_v31, %v288_v32 }
  0x14   :  { %v134_v18 = vand.u32 4294901760, %v133_v12  ;;  %194 = vmatpush.msra.mxu3 %v93_v4  ;;  %v140_v19 = vand.u32 4294901760, %v139_v14  ;;  %v324_v38 = vsub.f32 %v267_v33, %v290_v35  ;;  %v330_v43 = vsub.f32 %v266_v36, %v292_v39 }
  0x15   :  { %166 = vmatpush.msra.mxu2 %v127_v11  ;;  %v123_v20 = vsub.f32 %v121_v10, %v122_v15  ;;  %96 = vmatpush.msra.mxu0 %v95_v5  ;;  %v129_v21 = vsub.f32 %v127_v11, %v128_v16  ;;  %v101_v23 = vand.u32 4294901760, %v100_v17  ;;  %v319_v37 = vand.u32 4294901760, %v318_v34  ;;  %v487_v11 = vld [vmem:[%s652_s4] ss:$0 sm:$0xff] }
  0x16   :  { %v135_v22 = vsub.f32 %v133_v12, %v134_v18  ;;  %196 = vmatpush.msra.mxu3 %v95_v5  ;;  %v141_v27 = vsub.f32 %v139_v14, %v140_v19  ;;  %v325_v42 = vand.u32 4294901760, %v324_v38  ;;  %v294_v44 = vand.u32 4294901760, %v265_v40 }
  0x17   :  { %v124_v24 = vand.u32 4294901760, %v123_v20  ;;  %169 = vmatpush.msra.mxu2 %v133_v12  ;;  %v130_v25 = vand.u32 4294901760, %v129_v21  ;;  %98 = vmatpush.msra.mxu0 %v97_v8  ;;  %v102_v26 = vsub.f32 %v100_v17, %v101_v23  ;;  %v320_v41 = vsub.f32 %v318_v34, %v319_v37 }
  0x18   :  { %198 = vmatpush.msra.mxu3 %v97_v8  ;;  %v136_v28 = vand.u32 4294901760, %v135_v22  ;;  %v142_v30 = vand.u32 4294901760, %v141_v27  ;;  %v326_v46 = vsub.f32 %v324_v38, %v325_v42  ;;  %v331_v47 = vand.u32 4294901760, %v330_v43 }
  0x19   :  { %221 = vmatpush.msrb.mxu0 %v122_v15  ;;  %125 = vmatpush.msra.mxu1 %v124_v24  ;;  %v103_v29 = vand.u32 4294901760, %v102_v26  ;;  %v321_v45 = vand.u32 4294901760, %v320_v41  ;;  %v336_v48 = vsub.f32 %v265_v40, %v294_v44 }
  0x1a   :  { %172 = vmatpush.msra.mxu2 %v139_v14  ;;  %202 = vmatmul.f32.vlgmr.msra.gmra.mxu3 %v101_v23  ;;  %v327_v49 = vand.u32 4294901760, %v326_v46  ;;  %v332_v50 = vsub.f32 %v330_v43, %v331_v47 }
  0x1b   :  { %175 = vmatmul.f32.vlgmr.msra.gmra.mxu2 %v100_v17  ;;  %131 = vmatpush.msra.mxu1 %v130_v25  ;;  %v337_v51 = vand.u32 4294901760, %v336_v48 }
  0x1c   :  { %104 = vmatmul.f32.vlgmr.msra.gmra.mxu0 %v103_v29  ;;  %289 = vmatpush.msrb.mxu2 %v288_v32  ;;  %v333_v52 = vand.u32 4294901760, %v332_v50 }
  0x1d   :  { %225 = vmatpush.msrb.mxu0 %v128_v16  ;;  %137 = vmatpush.msra.mxu1 %v136_v28  ;;  %v338_v53 = vsub.f32 %v336_v48, %v337_v51 }
  0x1e   :  { %291 = vmatpush.msrb.mxu2 %v290_v35  ;;  %322 = vmatpush.msrb.mxu3 %v321_v45 }
  0x1f   :  { %229 = vmatpush.msrb.mxu0 %v134_v18  ;;  %143 = vmatpush.msra.mxu1 %v142_v30  ;;  %v339_v54 = vand.u32 4294901760, %v338_v53 }
  0x20   :  { %145 = vmatmul.f32.vlgmr.msra.gmra.mxu1 %v99_v13  ;;  %293 = vmatpush.msrb.mxu2 %v292_v39 }
  0x21   :  { %233 = vmatpush.msrb.mxu0 %v140_v19  ;;  %252 = vmatpush.msrb.mxu1 %v91_v3 }
  0x22   :  { %295 = vmatpush.msrb.mxu2 %v294_v44  ;;  %328 = vmatpush.msrb.mxu3 %v327_v49 }
  0x23   :  { %254 = vmatpush.msrb.mxu1 %v93_v4  ;;  %360 = vmatpush.msra.mxu0 %v318_v34 }
  0x24   :  { %235 = vmatmul.f32.vlgmr.msrb.gmra.mxu0 %v99_v13  ;;  %418 = vmatpush.msra.mxu2 %v319_v37 }
  0x25   :  { %256 = vmatpush.msrb.mxu1 %v95_v5  ;;  %363 = vmatpush.msra.mxu0 %v324_v38 }
  0x26   :  { %422 = vmatpush.msra.mxu2 %v325_v42  ;;  %334 = vmatpush.msrb.mxu3 %v333_v52 }
  0x27   :  { %258 = vmatpush.msrb.mxu1 %v97_v8  ;;  %366 = vmatpush.msra.mxu0 %v330_v43 }
  0x28   :  { %260 = vmatmul.f32.vlgmr.msrb.gmra.mxu1 %v99_v13  ;;  %426 = vmatpush.msra.mxu2 %v331_v47 }
  0x29   :  { %389 = vmatpush.msra.mxu1 %v288_v32  ;;  %369 = vmatpush.msra.mxu0 %v336_v48 }
  0x2a   :  { %340 = vmatpush.msrb.mxu3 %v339_v54  ;;  %430 = vmatpush.msra.mxu2 %v337_v51 }
  0x2b   :  { %391 = vmatpush.msra.mxu1 %v290_v35 }
  0x2c   :  { %449 = vmatpush.msra.mxu3 %v288_v32 }
  0x2d   :  { %393 = vmatpush.msra.mxu1 %v292_v39 }
  0x2e   :  { %451 = vmatpush.msra.mxu3 %v290_v35 }
  0x2f   :  { %395 = vmatpush.msra.mxu1 %v294_v44 }
  0x30   :  { %453 = vmatpush.msra.mxu3 %v292_v39 }
  0x32   :  { %455 = vmatpush.msra.mxu3 %v294_v44 }
  0x99   :  { %v105_v56 = vpop.f32.mrf.mxu0 }
  0x9a   :  { %v106_v57 = vadd.f32 %v486_v55, %v105_v56 }
  0x9d   :  { %v146_v58 = vpop.f32.mrf.mxu1  ;;  %v203_v61 = vpop.f32.mrf.mxu3 }
  0x9e   :  { %v176_v59 = vpop.f32.mrf.mxu2  ;;  %v147_v60 = vadd.f32 %v146_v58, %v106_v57 }
  0xa0   :  { %v177_v62 = vadd.f32 %v176_v59, %v147_v60 }
  0xa1   :  { %v236_v63 = vpop.f32.mrf.mxu0 }
  0xa2   :  { %v204_v0 = vadd.f32 %v203_v61, %v177_v62 }
  0xa4   :  { %v237_v1 = vadd.f32 %v236_v63, %v204_v0 }
  0xa5   :  { %v261_v2 = vpop.f32.mrf.mxu1 }
  0xa6   :  { %v262_v3 = vadd.f32 %v261_v2, %v237_v1 }
  0xa8   :  { %488 = vtanh.f32 %v262_v3 }
  0xae   :  { %v489_v4 = vpop.eup %488 }
  0xaf   :  { %v274_v5 = vsel %vm75_vm0, %v489_v4, 0 }
  0xb0   :  { %v296_v6 = vand.u32 4294901760, %v274_v5 }
  0xb2   :  { %342 = vmatmul.f32.vlgmr.msrb.gmra.mxu3 %v296_v6  ;;  %v297_v7 = vsub.f32 %v274_v5, %v296_v6 }
  0xb4   :  { %372 = vmatmul.f32.vlgmr.msra.gmra.mxu0 %v297_v7  ;;  %v298_v8 = vand.u32 4294901760, %v297_v7 }
  0xb6   :  { %399 = vmatmul.f32.vlgmr.msra.gmra.mxu1 %v298_v8  ;;  %v299_v9 = vsub.f32 %v297_v7, %v298_v8 }
  0xb8   :  { %v300_v10 = vand.u32 4294901760, %v299_v9 }
  0xba   :  { %301 = vmatmul.f32.vlgmr.msrb.gmra.mxu2 %v300_v10  ;;  %457 = vmatmul.f32.vlgmr.msra.gmra.mxu3 %v296_v6 }
  0xc2   :  { %432 = vmatmul.f32.vlgmr.msra.gmra.mxu2 %v296_v6 }
 0x131   :  { %v373_v16 = vpop.f32.mrf.mxu0 }
 0x133   :  { %v400_v18 = vpop.f32.mrf.mxu1 }
 0x135   :  { %v343_v12 = vpop.f32.mrf.mxu3 }
 0x13d   :  { %v302_v13 = vpop.f32.mrf.mxu2  ;;  %v458_v22 = vpop.f32.mrf.mxu3 }
 0x13e   :  { %v303_v14 = vadd.f32 %v487_v11, %v302_v13 }
 0x140   :  { %v344_v15 = vadd.f32 %v343_v12, %v303_v14 }
 0x142   :  { %v374_v17 = vadd.f32 %v373_v16, %v344_v15 }
 0x144   :  { %v401_v19 = vadd.f32 %v400_v18, %v374_v17 }
 0x145   :  { %v433_v20 = vpop.f32.mrf.mxu2 }
 0x146   :  { %v434_v21 = vadd.f32 %v433_v20, %v401_v19 }
 0x148   :  { %v459_v23 = vadd.f32 %v458_v22, %v434_v21 }
 0x14a   :  { %461 = vst [vmem:[#allocation8] sm:$0x3] %v459_v23 }
 0x14b   :  { %472 = dma.vmem_to_hbm [thread:$0]  %s468_s11, 32, %s470_s14, [#allocation4]  }
 0x14c   :  { %590 = dma.done.wait [#allocation4], 32  }
 0x14d   :  { %591 = vsyncadd [#allocation4], 4294967264 }
 0x14e   :  { %477 = vsyncpa [#allocation3], 1 }
 0x14f   :  { %478 = vsyncpa [#allocation6], 1 }
 0x150   :  { %479 = vsyncpa [#allocation4], 1 }

</bundles_post_ra>
